<compile_context>
chip_gen: v5e
topology: v5e:2x2
jax: 0.10.0
libtpu: 0.0.40
codegen_flags: <defaults>
</compile_context>

<pallas_src>
import functools

import numpy as np
import jax
import jax.numpy as jnp
from jax.experimental import pallas as pl
from jax.experimental.pallas import tpu as pltpu


def _cdiv(a, b):
    return (a + b - 1) // b


def _device_config():
    """Generation-aware budgets (v7x: 64 MiB per-TC VMEM, 2 TensorCores/chip)."""
    kind = ""
    try:
        kind = jax.devices()[0].device_kind.lower()
    except Exception:
        pass
    gen = 0
    for g in (7, 6, 5, 4, 3, 2):
        if str(g) in kind:
            gen = g
            break
    if gen >= 7:
        return {"vmem_limit": 36 * 1024 * 1024,   # well below 64 MiB physical/TC
                "tile_budget": 14 * 1024 * 1024,  # double-buffered input tiles
                "up_budget": 8 * 1024 * 1024,     # upsample-branch per-step budget
                "ncore": 2}                       # 2 TensorCores per chip
    return {"vmem_limit": 48 * 1024 * 1024,       # v5e/v6e: 128 MiB physical
            "tile_budget": 24 * 1024 * 1024,
            "up_budget": 10 * 1024 * 1024,
            "ncore": 1}                           # single TensorCore


# ----------------------------------------------------------------------------
# Bilinear interpolation matrices (align_corners=False), same math as
# F.interpolate(mode='bilinear', align_corners=False):  out = M @ in per axis.
# ----------------------------------------------------------------------------
def _bilinear_matrix(out_size: int, in_size: int) -> np.ndarray:
    m = np.zeros((out_size, in_size), dtype=np.float32)
    scale = in_size / out_size
    for i in range(out_size):
        src = (i + 0.5) * scale - 0.5
        if src < 0.0:
            src = 0.0
        i0 = int(np.floor(src))
        if i0 > in_size - 1:
            i0 = in_size - 1
        i1 = i0 + 1 if i0 < in_size - 1 else i0
        frac = src - i0
        m[i, i0] += 1.0 - frac
        m[i, i1] += frac
    return m


def _accumulate(pred_f32, gt_f32, acc_sum, acc_cnt, valid=None):
    """SmoothL1 (beta=1) with disparity mask, accumulated into (1, W) vectors.

    NB: the select (jnp.where) must stay a select (not multiply-by-mask) so
    garbage/NaN contents of partial-tile rows cannot propagate.
    """
    mask = (gt_f32 < 192.0) & (gt_f32 > 0.0)
    if valid is not None:
        mask = jnp.logical_and(mask, valid)
    diff = pred_f32 - gt_f32
    ad = jnp.abs(diff)
    elem = jnp.where(ad < 1.0, 0.5 * diff * diff, ad - 0.5)
    elem = jnp.where(mask, elem, 0.0)
    acc_sum[...] += jnp.sum(elem, axis=0, keepdims=True)
    acc_cnt[...] += jnp.sum(mask.astype(jnp.float32), axis=0, keepdims=True)


# ----------------------------------------------------------------------------
# Equal-resolution branch:  loss = mean_{(gt<192)&(gt>0)} smoothl1(pred - gt)
# ----------------------------------------------------------------------------
def _masked_smoothl1_kernel(pred_ref, gt_ref, sum_ref, cnt_ref, acc_sum, acc_cnt,
                            *, total_rows, row_tile, tiles_per_core):
    j = pl.program_id(1)

    @pl.when(j == 0)
    def _():
        acc_sum[...] = jnp.zeros_like(acc_sum)
        acc_cnt[...] = jnp.zeros_like(acc_cnt)

    pred = pred_ref[...].astype(jnp.float32)
    gt = gt_ref[...].astype(jnp.float32)

    # Global row range of this (possibly partial / overflow-clamped) tile.
    tile_idx = pl.program_id(0) * tiles_per_core + j
    row_start = tile_idx * row_tile
    needs_mask = row_start + row_tile > total_rows        # scalar

    @pl.when(jnp.logical_not(needs_mask))
    def _():
        # Interior tile: no per-element row mask on the hot path.
        _accumulate(pred, gt, acc_sum, acc_cnt)

    @pl.when(needs_mask)
    def _():
        # Tail / overflow tile: (rows, 1) validity column, broadcast over lanes.
        rows = row_start + jax.lax.broadcasted_iota(jnp.int32, (row_tile, 1), 0)
        _accumulate(pred, gt, acc_sum, acc_cnt, valid=rows < total_rows)

    @pl.when(j == pl.num_programs(1) - 1)
    def _():
        sum_ref[...] = acc_sum[...]
        cnt_ref[...] = acc_cnt[...]


def masked_smoothl1_mean(pred, gt):
    assert pred.shape == gt.shape
    cfg = _device_config()

    # Lane-dense 2D view: largest lane width L (multiple of 128) dividing the
    # element count, preferring views with >= 8 rows (full sublanes).
    total = int(np.prod(pred.shape))
    lane_w = None
    for min_rows in (8, 1):
        for cand in (2048, 1024, 512, 256, 128):
            if total % cand == 0 and total // cand >= min_rows:
                lane_w = cand
                break
        if lane_w is not None:
            break
    if lane_w is None:
        lane_w = int(pred.shape[-1])          # fallback: full-dim trailing width
    r = total // lane_w
    pred2 = pred.reshape(r, lane_w)           # free (contiguous) reshape
    gt2 = gt.reshape(r, lane_w)               # original dtype; cast in-kernel

    in_bytes = pred2.dtype.itemsize + gt2.dtype.itemsize
    row_tile = cfg["tile_budget"] // (2 * lane_w * in_bytes)   # 2 buffers/input
    row_tile = int(min(row_tile, 2048, max(r, 8)))
    row_tile = max(8, (row_tile // 8) * 8)

    total_tiles = _cdiv(r, row_tile)
    ncore = min(cfg["ncore"], total_tiles)    # 2-core split only on 2-TC parts
    tiles_per_core = _cdiv(total_tiles, ncore)

    def in_map(c, j):
        # Overflow tiles (odd tile count under the 2-core split) clamp to the
        # last valid block; their contribution is zeroed by the in-kernel mask.
        return (jnp.minimum(c * tiles_per_core + j, total_tiles - 1), 0)

    out_spec = pl.BlockSpec((None, 1, lane_w), lambda c, j: (c, 0, 0))

    kernel = functools.partial(_masked_smoothl1_kernel, total_rows=r,
                               row_tile=row_tile, tiles_per_core=tiles_per_core)

    s, cnt = pl.pallas_call(
        kernel,
        out_shape=(jax.ShapeDtypeStruct((ncore, 1, lane_w), jnp.float32),
                   jax.ShapeDtypeStruct((ncore, 1, lane_w), jnp.float32)),
        grid_spec=pltpu.PrefetchScalarGridSpec(
            num_scalar_prefetch=0,
            grid=(ncore, tiles_per_core),
            in_specs=[pl.BlockSpec((row_tile, lane_w), in_map),
                      pl.BlockSpec((row_tile, lane_w), in_map)],
            out_specs=(out_spec, out_spec),
            scratch_shapes=[pltpu.VMEM((1, lane_w), jnp.float32),
                            pltpu.VMEM((1, lane_w), jnp.float32)],
        ),
        compiler_params=pltpu.CompilerParams(
            dimension_semantics=("parallel", "arbitrary"),
            vmem_limit_bytes=cfg["vmem_limit"]),
    )(pred2, gt2)
    # NaN if no pixel passes the mask (matches torch mean over empty selection).
    return jnp.sum(s) / jnp.sum(cnt)


# ----------------------------------------------------------------------------
# Upsample branch, fused: bilinear resize (*scale) + masked SmoothL1 reduction.
# The upsampled prediction never round-trips HBM.
# ----------------------------------------------------------------------------
def _fused_upsample_loss_kernel(x_ref, gt_ref, mh_ref, mwt_ref, sum_ref, cnt_ref,
                                xw_ref, acc_sum, acc_cnt,
                                *, total_work, n_htiles, h_tile, h_gt,
                                work_per_core):
    j = pl.program_id(1)

    @pl.when(j == 0)
    def _():
        acc_sum[...] = jnp.zeros_like(acc_sum)
        acc_cnt[...] = jnp.zeros_like(acc_cnt)

    t = pl.program_id(0) * work_per_core + j       # global work item (unclamped)
    hi = t % n_htiles                              # h-tile index within the image

    # Hoisted width interpolation: xw = x @ mwt, recomputed once per image
    # (and at the first step of a core, which may start mid-image).
    # bf16 MXU inputs, f32 accumulation; result kept as bf16 for the row matmul.
    @pl.when((hi == 0) | (j == 0))
    def _():
        xw_ref[...] = jnp.dot(
            x_ref[...].astype(jnp.bfloat16),
            mwt_ref[...].astype(jnp.bfloat16),
            preferred_element_type=jnp.float32).astype(jnp.bfloat16)

    # Row interpolation for this h-tile (the module's `* scale` is folded
    # into the row matrix mh).
    up = jnp.dot(mh_ref[...].astype(jnp.bfloat16), xw_ref[...],
                 preferred_element_type=jnp.float32)            # (h_tile, w_gt)
    gt = gt_ref[...].astype(jnp.float32)

    row_start = hi * h_tile
    needs_mask = (row_start + h_tile > h_gt) | (t >= total_work)

    @pl.when(jnp.logical_not(needs_mask))
    def _():
        _accumulate(up, gt, acc_sum, acc_cnt)

    @pl.when(needs_mask)
    def _():
        # Tail h-tile of an image and/or overflow work item of the core split.
        row_limit = jnp.where(t < total_work, h_gt, 0)
        rows = row_start + jax.lax.broadcasted_iota(jnp.int32, (h_tile, 1), 0)
        _accumulate(up, gt, acc_sum, acc_cnt, valid=rows < row_limit)

    @pl.when(j == pl.num_programs(1) - 1)
    def _():
        sum_ref[...] = acc_sum[...]
        cnt_ref[...] = acc_cnt[...]


def _pick_h_tile(h_gt, w_gt, h_in, w_in, gt_itemsize, x_itemsize, budget):
    # Per-step live bytes: double-buffered gt + mh tiles, plus ~4 f32 row-slabs
    # of width w_gt for temporaries (up/diff/elem/mask).  Fixed per-image cost:
    # x double buffer, mwt double buffer, bf16 xw scratch.
    fixed = 2 * h_in * w_in * x_itemsize + 2 * w_in * w_gt * 4 + h_in * w_gt * 2
    per_row = 2 * w_gt * gt_itemsize + 2 * h_in * 4 + 4 * w_gt * 4
    th = max(8, (budget - fixed) // per_row)
    if th >= h_gt:
        return h_gt
    return max(8, (th // 8) * 8)


def fused_upsample_smoothl1_mean(disp_infer, disp_gt):
    n, ch, h_in, w_in = disp_infer.shape
    ng, chg, h_gt, w_gt = disp_gt.shape
    assert (n, ch) == (ng, chg)
    nc = n * ch
    cfg = _device_config()
    scale = w_gt // w_in                       # width-derived scale, as in the module

    # `* scale` of the module is folded into the row-interpolation matrix.
    mh = jnp.asarray(_bilinear_matrix(h_gt, h_in) * np.float32(scale))   # (h_gt, h_in)
    mwt = jnp.asarray(_bilinear_matrix(w_gt, w_in).T)                    # (w_in, w_gt)

    x3 = disp_infer.reshape(nc, h_in, w_in)    # original dtype; cast in-kernel
    g3 = disp_gt.reshape(nc, h_gt, w_gt)

    h_tile = _pick_h_tile(h_gt, w_gt, h_in, w_in,
                          g3.dtype.itemsize, x3.dtype.itemsize, cfg["up_budget"])
    n_htiles = _cdiv(h_gt, h_tile)
    total_work = nc * n_htiles                 # work item = (image, h-tile)
    ncore = min(cfg["ncore"], total_work)      # 2-core split only on 2-TC parts
    wpc = _cdiv(total_work, ncore)

    def _work(c, j):
        # Overflow work items clamp to the last valid one; zeroed in-kernel.
        return jnp.minimum(c * wpc + j, total_work - 1)

    x_map = lambda c, j: (_work(c, j) // n_htiles, 0, 0)
    gt_map = lambda c, j: (_work(c, j) // n_htiles, _work(c, j) % n_htiles, 0)
    mh_map = lambda c, j: (_work(c, j) % n_htiles, 0)
    mwt_map = lambda c, j: (0, 0)
    out_spec = pl.BlockSpec((None, 1, w_gt), lambda c, j: (c, 0, 0))

    kernel = functools.partial(_fused_upsample_loss_kernel,
                               total_work=total_work, n_htiles=n_htiles,
                               h_tile=h_tile, h_gt=h_gt, work_per_core=wpc)

    s, cnt = pl.pallas_call(
        kernel,
        out_shape=(jax.ShapeDtypeStruct((ncore, 1, w_gt), jnp.float32),
                   jax.ShapeDtypeStruct((ncore, 1, w_gt), jnp.float32)),
        grid_spec=pltpu.PrefetchScalarGridSpec(
            num_scalar_prefetch=0,
            grid=(ncore, wpc),
            in_specs=[pl.BlockSpec((None, h_in, w_in), x_map),
                      pl.BlockSpec((None, h_tile, w_gt), gt_map),
                      pl.BlockSpec((h_tile, h_in), mh_map),
                      pl.BlockSpec((w_in, w_gt), mwt_map)],
            out_specs=(out_spec, out_spec),
            scratch_shapes=[pltpu.VMEM((h_in, w_gt), jnp.bfloat16),   # xw
                            pltpu.VMEM((1, w_gt), jnp.float32),       # acc_sum
                            pltpu.VMEM((1, w_gt), jnp.float32)],      # acc_cnt
        ),
        compiler_params=pltpu.CompilerParams(
            dimension_semantics=("parallel", "arbitrary"),
            vmem_limit_bytes=cfg["vmem_limit"]),
    )(x3, g3, mh, mwt)
    return jnp.sum(s) / jnp.sum(cnt)


# ----------------------------------------------------------------------------
# SingleScaleLoss.forward equivalent (loss='Smooth_l1'; no learnable params).
# ----------------------------------------------------------------------------
def single_scale_loss(disp_infer, disp_gt):
    if disp_infer.shape[-1] != disp_gt.shape[-1]:
        return fused_upsample_smoothl1_mean(disp_infer, disp_gt)
    return masked_smoothl1_mean(disp_infer, disp_gt)


if __name__ == "__main__":
    key = jax.random.PRNGKey(0)
    k1, k2, k3 = jax.random.split(key, 3)

    # Branch 1: prediction already at GT resolution.
    disp_gt = jax.random.uniform(k1, (2, 4, 16, 16), jnp.float32,
                                 minval=-5.0, maxval=200.0)
    disp_infer = jax.random.uniform(k2, (2, 4, 16, 16), jnp.float32,
                                    minval=0.0, maxval=195.0)
    loss_same = single_scale_loss(disp_infer, disp_gt)

    # Pure-JAX reference for the equal-resolution branch.
    m = (disp_gt < 192.0) & (disp_gt > 0.0)
    d = disp_infer - disp_gt
    e = jnp.where(jnp.abs(d) < 1.0, 0.5 * d * d, jnp.abs(d) - 0.5)
    ref_same = jnp.sum(jnp.where(m, e, 0.0)) / jnp.sum(m)
    assert jnp.allclose(loss_same, ref_same, rtol=1e-4, atol=1e-4), (loss_same, ref_same)

    # Branch 2: low-res prediction -> fused bilinear upsample * scale + loss.
    disp_infer_lo = jax.random.uniform(k3, (2, 4, 8, 8), jnp.float32,
                                       minval=0.0, maxval=100.0)
    loss_up = single_scale_loss(disp_infer_lo, disp_gt)

    # Pure-JAX f32 reference (same interpolation matrices).  The kernel feeds
    # the MXU bf16 inputs (f32 accumulation), so allow bf16-level tolerance.
    mh_np = _bilinear_matrix(16, 8)
    mw_np = _bilinear_matrix(16, 8)
    up_ref = jnp.einsum('oh,bchw,vw->bcov', jnp.asarray(mh_np), disp_infer_lo,
                        jnp.asarray(mw_np)) * 2.0
    d2 = up_ref - disp_gt
    e2 = jnp.where(jnp.abs(d2) < 1.0, 0.5 * d2 * d2, jnp.abs(d2) - 0.5)
    ref_up = jnp.sum(jnp.where(m, e2, 0.0)) / jnp.sum(m)
    assert jnp.allclose(loss_up, ref_up, rtol=2e-2, atol=2e-2), (loss_up, ref_up)

    jax.block_until_ready((loss_same, loss_up))
    print("KERNEL_OK")
</pallas_src>

<mosaic_0001>
module attributes {stable_mosaic.version = 11 : i64} {
  func.func @_masked_smoothl1_kernel(%arg0: i32, %arg1: i32, %arg2: memref<8x256xf32, #tpu.memory_space<vmem>>, %arg3: memref<8x256xf32, #tpu.memory_space<vmem>>, %arg4: memref<1x1x256xf32, #tpu.memory_space<vmem>>, %arg5: memref<1x1x256xf32, #tpu.memory_space<vmem>>, %arg6: memref<1x256xf32, #tpu.memory_space<vmem>>, %arg7: memref<1x256xf32, #tpu.memory_space<vmem>>) attributes {dimension_semantics = [#tpu.dimension_semantics<parallel>, #tpu.dimension_semantics<arbitrary>], iteration_bounds = array<i64: 1, 1>, scalar_prefetch = 0 : i64, scratch_operands = 2 : i64, tpu.core_type = #tpu.core_type<tc>, window_params = [{transform_indices = @transform_0, window_bounds = array<i64: 8, 256>}, {transform_indices = @transform_1, window_bounds = array<i64: 8, 256>}, {transform_indices = @transform_2, window_bounds = array<i64: 1, 1, 256>}, {transform_indices = @transform_3, window_bounds = array<i64: 1, 1, 256>}]} {
    %c0_i32 = arith.constant 0 : i32
    %0 = arith.cmpi eq, %arg1, %c0_i32 : i32
    %1 = arith.extui %0 : i1 to i32
    %c0_i32_0 = arith.constant 0 : i32
    %2 = arith.cmpi ne, %1, %c0_i32_0 : i32
    scf.if %2 {
      %cst = arith.constant 0.000000e+00 : f32
      %18 = vector.broadcast %cst : f32 to vector<1x256xf32>
      %c0_10 = arith.constant 0 : index
      %c0_11 = arith.constant 0 : index
      %19 = vector.load %arg6[%c0_10, %c0_11] : memref<1x256xf32, #tpu.memory_space<vmem>>, vector<1x256xf32>
      tpu.vector_store %arg6[%c0_10, %c0_11], %18 {strides = array<i32>} : memref<1x256xf32, #tpu.memory_space<vmem>>, vector<1x256xf32>,
      %cst_12 = arith.constant 0.000000e+00 : f32
      %20 = vector.broadcast %cst_12 : f32 to vector<1x256xf32>
      %c0_13 = arith.constant 0 : index
      %c0_14 = arith.constant 0 : index
      %21 = vector.load %arg7[%c0_13, %c0_14] : memref<1x256xf32, #tpu.memory_space<vmem>>, vector<1x256xf32>
      tpu.vector_store %arg7[%c0_13, %c0_14], %20 {strides = array<i32>} : memref<1x256xf32, #tpu.memory_space<vmem>>, vector<1x256xf32>,
    } else {
    }
    %c0 = arith.constant 0 : index
    %c0_1 = arith.constant 0 : index
    %3 = vector.load %arg2[%c0, %c0_1] : memref<8x256xf32, #tpu.memory_space<vmem>>, vector<8x256xf32>
    %c0_2 = arith.constant 0 : index
    %c0_3 = arith.constant 0 : index
    %4 = vector.load %arg3[%c0_2, %c0_3] : memref<8x256xf32, #tpu.memory_space<vmem>>, vector<8x256xf32>
    %c1_i32 = arith.constant 1 : i32
    %5 = arith.muli %arg0, %c1_i32 : i32
    %6 = arith.addi %5, %arg1 : i32
    %c8_i32 = arith.constant 8 : i32
    %7 = arith.muli %6, %c8_i32 : i32
    %c8_i32_4 = arith.constant 8 : i32
    %8 = arith.addi %7, %c8_i32_4 : i32
    %c8_i32_5 = arith.constant 8 : i32
    %9 = arith.cmpi sgt, %8, %c8_i32_5 : i32
    %true = arith.constant true
    %10 = arith.xori %9, %true : i1
    %11 = arith.extui %10 : i1 to i32
    %c0_i32_6 = arith.constant 0 : i32
    %12 = arith.cmpi ne, %11, %c0_i32_6 : i32
    scf.if %12 {
      %cst = arith.constant 1.920000e+02 : f32
      %18 = vector.broadcast %cst : f32 to vector<8x256xf32>
      %19 = arith.cmpf olt, %4, %18 : vector<8x256xf32>
      %cst_10 = arith.constant 0.000000e+00 : f32
      %20 = vector.broadcast %cst_10 : f32 to vector<8x256xf32>
      %21 = arith.cmpf ogt, %4, %20 : vector<8x256xf32>
      %22 = arith.andi %19, %21 : vector<8x256xi1>
      %23 = arith.subf %3, %4 : vector<8x256xf32>
      %24 = math.absf %23 : vector<8x256xf32>
      %cst_11 = arith.constant 1.000000e+00 : f32
      %25 = vector.broadcast %cst_11 : f32 to vector<8x256xf32>
      %26 = arith.cmpf olt, %24, %25 : vector<8x256xf32>
      %cst_12 = arith.constant 5.000000e-01 : f32
      %27 = vector.broadcast %cst_12 : f32 to vector<8x256xf32>
      %28 = arith.mulf %27, %23 : vector<8x256xf32>
      %29 = arith.mulf %28, %23 : vector<8x256xf32>
      %cst_13 = arith.constant 5.000000e-01 : f32
      %30 = vector.broadcast %cst_13 : f32 to vector<8x256xf32>
      %31 = arith.subf %24, %30 : vector<8x256xf32>
      %32 = arith.select %26, %29, %31 : vector<8x256xi1>, vector<8x256xf32>
      %cst_14 = arith.constant 0.000000e+00 : f32
      %33 = vector.broadcast %cst_14 : f32 to vector<8x256xf32>
      %34 = arith.select %22, %32, %33 : vector<8x256xi1>, vector<8x256xf32>
      %c0_15 = arith.constant 0 : index
      %c0_16 = arith.constant 0 : index
      %35 = vector.load %arg6[%c0_15, %c0_16] : memref<1x256xf32, #tpu.memory_space<vmem>>, vector<1x256xf32>
      %cst_17 = arith.constant dense<0.000000e+00> : vector<256xf32>
      %36 = vector.multi_reduction <add>, %34, %cst_17 [0] : vector<8x256xf32> to vector<256xf32>
      %37 = vector.shape_cast %36 : vector<256xf32> to vector<1x256xf32>
      %38 = arith.addf %35, %37 : vector<1x256xf32>
      %c0_18 = arith.constant 0 : index
      %c0_19 = arith.constant 0 : index
      %39 = vector.load %arg6[%c0_18, %c0_19] : memref<1x256xf32, #tpu.memory_space<vmem>>, vector<1x256xf32>
      tpu.vector_store %arg6[%c0_18, %c0_19], %38 {strides = array<i32>} : memref<1x256xf32, #tpu.memory_space<vmem>>, vector<1x256xf32>,
      %c0_20 = arith.constant 0 : index
      %c0_21 = arith.constant 0 : index
      %40 = vector.load %arg7[%c0_20, %c0_21] : memref<1x256xf32, #tpu.memory_space<vmem>>, vector<1x256xf32>
      %41 = arith.extui %22 : vector<8x256xi1> to vector<8x256xi32>
      %42 = arith.sitofp %41 : vector<8x256xi32> to vector<8x256xf32>
      %cst_22 = arith.constant dense<0.000000e+00> : vector<256xf32>
      %43 = vector.multi_reduction <add>, %42, %cst_22 [0] : vector<8x256xf32> to vector<256xf32>
      %44 = vector.shape_cast %43 : vector<256xf32> to vector<1x256xf32>
      %45 = arith.addf %40, %44 : vector<1x256xf32>
      %c0_23 = arith.constant 0 : index
      %c0_24 = arith.constant 0 : index
      %46 = vector.load %arg7[%c0_23, %c0_24] : memref<1x256xf32, #tpu.memory_space<vmem>>, vector<1x256xf32>
      tpu.vector_store %arg7[%c0_23, %c0_24], %45 {strides = array<i32>} : memref<1x256xf32, #tpu.memory_space<vmem>>, vector<1x256xf32>,
    } else {
    }
    %13 = arith.extui %9 : i1 to i32
    %c0_i32_7 = arith.constant 0 : i32
    %14 = arith.cmpi ne, %13, %c0_i32_7 : i32
    scf.if %14 {
      %18 = tpu.iota {dimensions = array<i32: 0>} : vector<8x1xi32>
      %19 = vector.broadcast %7 : i32 to vector<8x1xi32>
      %20 = arith.addi %19, %18 : vector<8x1xi32>
      %c8_i32_10 = arith.constant 8 : i32
      %21 = vector.broadcast %c8_i32_10 : i32 to vector<8x1xi32>
      %22 = arith.cmpi slt, %20, %21 : vector<8x1xi32>
      %cst = arith.constant 1.920000e+02 : f32
      %23 = vector.broadcast %cst : f32 to vector<8x256xf32>
      %24 = arith.cmpf olt, %4, %23 : vector<8x256xf32>
      %cst_11 = arith.constant 0.000000e+00 : f32
      %25 = vector.broadcast %cst_11 : f32 to vector<8x256xf32>
      %26 = arith.cmpf ogt, %4, %25 : vector<8x256xf32>
      %27 = arith.andi %24, %26 : vector<8x256xi1>
      %28 = vector.broadcast %22 : vector<8x1xi1> to vector<8x256xi1>
      %29 = arith.andi %27, %28 : vector<8x256xi1>
      %30 = arith.subf %3, %4 : vector<8x256xf32>
      %31 = math.absf %30 : vector<8x256xf32>
      %cst_12 = arith.constant 1.000000e+00 : f32
      %32 = vector.broadcast %cst_12 : f32 to vector<8x256xf32>
      %33 = arith.cmpf olt, %31, %32 : vector<8x256xf32>
      %cst_13 = arith.constant 5.000000e-01 : f32
      %34 = vector.broadcast %cst_13 : f32 to vector<8x256xf32>
      %35 = arith.mulf %34, %30 : vector<8x256xf32>
      %36 = arith.mulf %35, %30 : vector<8x256xf32>
      %cst_14 = arith.constant 5.000000e-01 : f32
      %37 = vector.broadcast %cst_14 : f32 to vector<8x256xf32>
      %38 = arith.subf %31, %37 : vector<8x256xf32>
      %39 = arith.select %33, %36, %38 : vector<8x256xi1>, vector<8x256xf32>
      %cst_15 = arith.constant 0.000000e+00 : f32
      %40 = vector.broadcast %cst_15 : f32 to vector<8x256xf32>
      %41 = arith.select %29, %39, %40 : vector<8x256xi1>, vector<8x256xf32>
      %c0_16 = arith.constant 0 : index
      %c0_17 = arith.constant 0 : index
      %42 = vector.load %arg6[%c0_16, %c0_17] : memref<1x256xf32, #tpu.memory_space<vmem>>, vector<1x256xf32>
      %cst_18 = arith.constant dense<0.000000e+00> : vector<256xf32>
      %43 = vector.multi_reduction <add>, %41, %cst_18 [0] : vector<8x256xf32> to vector<256xf32>
      %44 = vector.shape_cast %43 : vector<256xf32> to vector<1x256xf32>
      %45 = arith.addf %42, %44 : vector<1x256xf32>
      %c0_19 = arith.constant 0 : index
      %c0_20 = arith.constant 0 : index
      %46 = vector.load %arg6[%c0_19, %c0_20] : memref<1x256xf32, #tpu.memory_space<vmem>>, vector<1x256xf32>
      tpu.vector_store %arg6[%c0_19, %c0_20], %45 {strides = array<i32>} : memref<1x256xf32, #tpu.memory_space<vmem>>, vector<1x256xf32>,
      %c0_21 = arith.constant 0 : index
      %c0_22 = arith.constant 0 : index
      %47 = vector.load %arg7[%c0_21, %c0_22] : memref<1x256xf32, #tpu.memory_space<vmem>>, vector<1x256xf32>
      %48 = arith.extui %29 : vector<8x256xi1> to vector<8x256xi32>
      %49 = arith.sitofp %48 : vector<8x256xi32> to vector<8x256xf32>
      %cst_23 = arith.constant dense<0.000000e+00> : vector<256xf32>
      %50 = vector.multi_reduction <add>, %49, %cst_23 [0] : vector<8x256xf32> to vector<256xf32>
      %51 = vector.shape_cast %50 : vector<256xf32> to vector<1x256xf32>
      %52 = arith.addf %47, %51 : vector<1x256xf32>
      %c0_24 = arith.constant 0 : index
      %c0_25 = arith.constant 0 : index
      %53 = vector.load %arg7[%c0_24, %c0_25] : memref<1x256xf32, #tpu.memory_space<vmem>>, vector<1x256xf32>
      tpu.vector_store %arg7[%c0_24, %c0_25], %52 {strides = array<i32>} : memref<1x256xf32, #tpu.memory_space<vmem>>, vector<1x256xf32>,
    } else {
    }
    %c0_i32_8 = arith.constant 0 : i32
    %15 = arith.cmpi eq, %arg1, %c0_i32_8 : i32
    %16 = arith.extui %15 : i1 to i32
    %c0_i32_9 = arith.constant 0 : i32
    %17 = arith.cmpi ne, %16, %c0_i32_9 : i32
    scf.if %17 {
      %c0_10 = arith.constant 0 : index
      %c0_11 = arith.constant 0 : index
      %18 = vector.load %arg6[%c0_10, %c0_11] : memref<1x256xf32, #tpu.memory_space<vmem>>, vector<1x256xf32>
      %c0_12 = arith.constant 0 : index
      %c0_13 = arith.constant 0 : index
      %c0_14 = arith.constant 0 : index
      %19 = vector.load %arg4[%c0_12, %c0_13, %c0_14] : memref<1x1x256xf32, #tpu.memory_space<vmem>>, vector<1x1x256xf32>
      %20 = vector.shape_cast %19 : vector<1x1x256xf32> to vector<1x256xf32>
      %21 = vector.shape_cast %18 : vector<1x256xf32> to vector<1x1x256xf32>
      tpu.vector_store %arg4[%c0_12, %c0_13, %c0_14], %21 {strides = array<i32>} : memref<1x1x256xf32, #tpu.memory_space<vmem>>, vector<1x1x256xf32>,
      %c0_15 = arith.constant 0 : index
      %c0_16 = arith.constant 0 : index
      %22 = vector.load %arg7[%c0_15, %c0_16] : memref<1x256xf32, #tpu.memory_space<vmem>>, vector<1x256xf32>
      %c0_17 = arith.constant 0 : index
      %c0_18 = arith.constant 0 : index
      %c0_19 = arith.constant 0 : index
      %23 = vector.load %arg5[%c0_17, %c0_18, %c0_19] : memref<1x1x256xf32, #tpu.memory_space<vmem>>, vector<1x1x256xf32>
      %24 = vector.shape_cast %23 : vector<1x1x256xf32> to vector<1x256xf32>
      %25 = vector.shape_cast %22 : vector<1x256xf32> to vector<1x1x256xf32>
      tpu.vector_store %arg5[%c0_17, %c0_18, %c0_19], %25 {strides = array<i32>} : memref<1x1x256xf32, #tpu.memory_space<vmem>>, vector<1x1x256xf32>,
    } else {
    }
    return
  }
  func.func @transform_0(%arg0: i32, %arg1: i32) -> (i32, i32) {
    %c1_i32 = arith.constant 1 : i32
    %0 = arith.muli %arg0, %c1_i32 : i32
    %1 = arith.addi %0, %arg1 : i32
    %c0_i32 = arith.constant 0 : i32
    %2 = arith.minsi %1, %c0_i32 : i32
    %c0_i32_0 = arith.constant 0 : i32
    %c0_i32_1 = arith.constant 0 : i32
    return %2, %c0_i32_0 : i32, i32
  }
  func.func @transform_1(%arg0: i32, %arg1: i32) -> (i32, i32) {
    %c1_i32 = arith.constant 1 : i32
    %0 = arith.muli %arg0, %c1_i32 : i32
    %1 = arith.addi %0, %arg1 : i32
    %c0_i32 = arith.constant 0 : i32
    %2 = arith.minsi %1, %c0_i32 : i32
    %c0_i32_0 = arith.constant 0 : i32
    %c0_i32_1 = arith.constant 0 : i32
    return %2, %c0_i32_0 : i32, i32
  }
  func.func @transform_2(%arg0: i32, %arg1: i32) -> (i32, i32, i32) {
    %c0_i32 = arith.constant 0 : i32
    %c0_i32_0 = arith.constant 0 : i32
    %c0_i32_1 = arith.constant 0 : i32
    return %arg0, %c0_i32, %c0_i32_0 : i32, i32, i32
  }
  func.func @transform_3(%arg0: i32, %arg1: i32) -> (i32, i32, i32) {
    %c0_i32 = arith.constant 0 : i32
    %c0_i32_0 = arith.constant 0 : i32
    %c0_i32_1 = arith.constant 0 : i32
    return %arg0, %c0_i32, %c0_i32_0 : i32, i32, i32
  }
}

</mosaic_0001>

<bundles_post_ra>
// kernel: tpu_custom_call.1
= control target key start
LH: loop header
LB: loop body
LE: loop exit
PB: predicated region body
PF: predicated region fallthrough
CT: control target
= control target key end

     0   :  { %9 = vsyncpa [#allocation5], 0  ;;  %s472_s0 = inlined_call_operand.hbm [shape: f32[8,256], index: 0, kind: input, shape index: {}]   ;;  %s473_s1 = inlined_call_operand.hbm [shape: f32[8,256], index: 1, kind: input, shape index: {}]   ;;  %s474_s2 = inlined_call_operand.hbm [shape: f32[1,1,256], index: 2, kind: output, shape index: {0}]   ;;  %s475_s3 = inlined_call_operand.hbm [shape: f32[1,1,256], index: 3, kind: output, shape index: {1}]  }
   0x1   :  { %10 = vsyncpa [#allocation8], 0 }
   0x2   :  { %11 = vsyncpa [#allocation6], 0 }
   0x3   :  { %12 = vsyncpa [#allocation11], 0  ;;  %s24_s14 = sshll.u32 %s472_s0, 4  ;;  %s403_s15 = smov [#allocation4]   ;;  %s25_s14 = int_to_ptr.hbm [resolvable:$true] %s24_s14 }
   0x4   :  { %s26_s16 = sshll.u32 %s403_s15, 4  ;;  %s41_s19 = sshll.u32 %s473_s1, 4  ;;  %s27_s16 = int_to_ptr.vmem [resolvable:$true] %s26_s16  ;;  %s42_s19 = int_to_ptr.hbm [resolvable:$true] %s41_s19 }
   0x5   :  { %29 = dma.hbm_to_vmem [thread:$0]  %s25_s14, 256, %s27_s16, [#allocation5]  }
   0x6   :  { %s404_s20 = smov [#allocation7]  }
   0x7   :  { %s43_s21 = sshll.u32 %s404_s20, 4  ;;  %s44_s21 = int_to_ptr.vmem [resolvable:$true] %s43_s21 }
   0x8   :  { %46 = dma.hbm_to_vmem [thread:$0]  %s42_s19, 256, %s44_s21, [#allocation8]  }
   0x9   :  { %395 = dma.done.wait [#allocation5], 256  }
   0xa   :  { %396 = vsyncadd [#allocation5], 4294967040 }
   0xb   :  { %397 = dma.done.wait [#allocation8], 256  }
   0xc   :  { %398 = vsyncadd [#allocation8], 4294967040  ;;  %v65_v0 = vlaneseq  ;;  %v405_v2 = vmov 0.0   ;;  %v71_v3 = vld [vmem:[#allocation4] sm:$0xff]  ;;  %v72_v4 = vld [vmem:[#allocation4 + $0x8] sm:$0xff]  ;;  %vm121_vm9 = vcmask 1040384  }
   0xd   :  { %v73_v5 = vld [vmem:[#allocation7] sm:$0xff]  ;;  %v74_v6 = vld [vmem:[#allocation7 + $0x8] sm:$0xff]  ;;  %s406_s0 = smov [#allocation10]   ;;  %s266_s24 = sshll.u32 %s475_s3, 4  ;;  %s267_s24 = int_to_ptr.hbm [resolvable:$true] %s266_s24 }
   0xe   :  { %vm434_vm0 = vcmp.lt.s32.totalorder %v65_v0, 256  ;;  %vm83_vm1 = vcmp.lt.f32.partialorder %v73_v5, 192.0  ;;  %vm85_vm2 = vcmp.gt.f32.partialorder %v73_v5, 0.0  ;;  %v89_v7 = vsub.f32 %v71_v3, %v73_v5  ;;  %s264_s1 = sshll.u32 %s406_s0, 4  ;;  %s407_s25 = smov [#allocation9]   ;;  %s265_s1 = int_to_ptr.vmem [resolvable:$true] %s264_s1 }
   0xf   :  { %69 = vst.msk [vmem:[#allocation2] sm:$0x3] %vm434_vm0, %v405_v2  ;;  %vm84_vm3 = vcmp.lt.f32.partialorder %v74_v6, 192.0  ;;  %vm86_vm4 = vcmp.gt.f32.partialorder %v74_v6, 0.0  ;;  %vm442_vm5 = vmand %vm83_vm1, %vm85_vm2  ;;  %v90_v9 = vsub.f32 %v72_v4, %v74_v6  ;;  %s253_s26 = sshll.u32 %s407_s25, 4  ;;  %s255_s29 = sshll.u32 %s474_s2, 4  ;;  %s254_s26 = int_to_ptr.vmem [resolvable:$true] %s253_s26  ;;  %s256_s29 = int_to_ptr.hbm [resolvable:$true] %s255_s29 }
  0x10   :  { %70 = vst.msk [vmem:[#allocation3] sm:$0x3] %vm434_vm0, %v405_v2  ;;  %vm446_vm6 = vmand %vm84_vm3, %vm86_vm4  ;;  %v91_v11 = vand.u32 2147483647, %v89_v7  ;;  %v95_v12 = vmul.f32 0.5, %v89_v7  ;;  %v288_v13 = vsel %vm442_vm5, 1.0, %v405_v2 }
  0x11   :  { %v92_v14 = vand.u32 2147483647, %v90_v9  ;;  %v96_v15 = vmul.f32 0.5, %v90_v9  ;;  %v289_v16 = vsel %vm446_vm6, 1.0, %v405_v2  ;;  %v135_v17 = vrot.slane %v288_v13, 4 }
  0x12   :  { %vm93_vm7 = vcmp.lt.f32.partialorder %v91_v11, 1.0  ;;  %v97_v18 = vmul.f32 %v95_v12, %v89_v7  ;;  %v286_v19 = vadd.f32 -0.5, %v91_v11  ;;  %v141_v20 = vrot.slane %v289_v16, 4 }
  0x13   :  { %vm94_vm8 = vcmp.lt.f32.partialorder %v92_v14, 1.0  ;;  %v98_v21 = vmul.f32 %v96_v15, %v90_v9  ;;  %v287_v22 = vadd.f32 -0.5, %v92_v14  ;;  %v136_v23 = vadd.f32 %v288_v13, %v135_v17 }
  0x14   :  { %v101_v24 = vsel %vm93_vm7, %v97_v18, %v286_v19  ;;  %v142_v25 = vadd.f32 %v289_v16, %v141_v20 }
  0x15   :  { %v102_v26 = vsel %vm94_vm8, %v98_v21, %v287_v22  ;;  %v103_v27 = vsel %vm442_vm5, %v101_v24, 0.0  ;;  %v137_v28 = vrot.slane %v136_v23, 2 }
  0x16   :  { %v104_v29 = vsel %vm446_vm6, %v102_v26, 0.0  ;;  %v106_v30 = vrot.slane %v103_v27, 4  ;;  %v143_v31 = vrot.slane %v142_v25, 2  ;;  %v105_v53 = vld [vmem:[#allocation2] sm:$0x3] }
  0x17   :  { %v112_v32 = vrot.slane %v104_v29, 4  ;;  %v138_v33 = vadd.f32 %v137_v28, %v136_v23  ;;  %v130_v46 = vld [vmem:[#allocation3] sm:$0x3] }
  0x18   :  { %v107_v34 = vadd.f32 %v106_v30, %v103_v27  ;;  %v144_v35 = vadd.f32 %v143_v31, %v142_v25 }
  0x19   :  { %v113_v36 = vadd.f32 %v112_v32, %v104_v29  ;;  %v139_v37 = vrot.slane %v138_v33, 1 }
  0x1a   :  { %v108_v38 = vrot.slane %v107_v34, 2  ;;  %v145_v39 = vrot.slane %v144_v35, 1 }
  0x1b   :  { %v114_v40 = vrot.slane %v113_v36, 2  ;;  %v140_v43 = vadd.f32 %v139_v37, %v138_v33 }
  0x1c   :  { %v109_v41 = vadd.f32 %v108_v38, %v107_v34  ;;  %v146_v42 = vadd.f32 %v145_v39, %v144_v35 }
  0x1d   :  { %v115_v44 = vadd.f32 %v114_v40, %v113_v36 }
  0x1e   :  { %v110_v45 = vrot.slane %v109_v41, 1  ;;  %v149_v47 = vrot.slane %v146_v42, 7 }
  0x1f   :  { %v116_v48 = vrot.slane %v115_v44, 1 }
  0x20   :  { %v150_v49 = vsel %vm121_vm9, %v140_v43, %v149_v47  ;;  %v111_v50 = vadd.f32 %v110_v45, %v109_v41 }
  0x21   :  { %v117_v51 = vadd.f32 %v116_v48, %v115_v44  ;;  %v152_v52 = vadd.f32 %v150_v49, %v130_v46 }
  0x23   :  { %v120_v54 = vrot.slane %v117_v51, 7  ;;  %153 = vst.msk [vmem:[#allocation3] sm:$0x3] %vm434_vm0, %v152_v52 }
  0x25   :  { %v122_v55 = vsel %vm121_vm9, %v111_v50, %v120_v54 }
  0x26   :  { %v124_v56 = vadd.f32 %v122_v55, %v105_v53 }
  0x28   :  { %129 = vst.msk [vmem:[#allocation2] sm:$0x3] %vm434_vm0, %v124_v56 }
  0x2a   :  { %v246_v57 = vld [vmem:[#allocation3] sm:$0x3] }
  0x2b   :  { %247 = vst.msk [vmem:[#allocation10] sm:$0x3] %vm434_vm0, %v246_v57 }
  0x2c   :  { %269 = dma.vmem_to_hbm [thread:$0]  %s265_s1, 32, %s267_s24, [#allocation11]  }
  0x2f   :  { %v240_v58 = vld [vmem:[#allocation2] sm:$0x3] }
  0x30   :  { %245 = vst.msk [vmem:[#allocation9] sm:$0x3] %vm434_vm0, %v240_v58 }
  0x31   :  { %258 = dma.vmem_to_hbm [thread:$0]  %s254_s26, 32, %s256_s29, [#allocation6]  }
  0x32   :  { %399 = dma.done.wait [#allocation6], 32  }
  0x33   :  { %400 = vsyncadd [#allocation6], 4294967264 }
  0x34   :  { %401 = dma.done.wait [#allocation11], 32  }
  0x35   :  { %402 = vsyncadd [#allocation11], 4294967264 }
  0x36   :  { %278 = vsyncpa [#allocation5], 1 }
  0x37   :  { %279 = vsyncpa [#allocation8], 1 }
  0x38   :  { %280 = vsyncpa [#allocation6], 1 }
  0x39   :  { %281 = vsyncpa [#allocation11], 1 }

</bundles_post_ra>
